<compile_context>
chip_gen: v5e
topology: v5e:2x2
jax: 0.10.0
libtpu: 0.0.40
codegen_flags: <defaults>
</compile_context>

<pallas_src>
import jax
import jax.numpy as jnp
from jax.experimental import pallas as pl
from jax.experimental.pallas import tpu as pltpu

HIDDEN = 128      # every hidden Linear in the module is 128 wide
_LANE = 128


def _round_up(x, m):
    return (x + m - 1) // m * m


# ----------------------------------------------------------------------------
# Kernel: one (TB, D_pad) batch tile through all four Linear+ReLU layers.
# ----------------------------------------------------------------------------
def ae_kernel(x_ref,
              w1_ref, b1_ref,
              w2_ref, b2_ref,
              w3_ref, b3_ref,
              w4_ref, b4_ref,
              o_ref):
    cdt = w1_ref.dtype                     # compute dtype (bf16 or f32)
    x = x_ref[...].astype(cdt)             # in-kernel cast of the f32 tile

    # encoder_hidden_layer + relu
    h = jnp.dot(x, w1_ref[...], preferred_element_type=jnp.float32)
    h = jnp.maximum(h + b1_ref[...], 0.0).astype(cdt)

    # encoder_output_layer + relu
    h = jnp.dot(h, w2_ref[...], preferred_element_type=jnp.float32)
    h = jnp.maximum(h + b2_ref[...], 0.0).astype(cdt)

    # decoder_hidden_layer + relu
    h = jnp.dot(h, w3_ref[...], preferred_element_type=jnp.float32)
    h = jnp.maximum(h + b3_ref[...], 0.0).astype(cdt)

    # decoder_output_layer + relu
    h = jnp.dot(h, w4_ref[...], preferred_element_type=jnp.float32)
    h = jnp.maximum(h + b4_ref[...], 0.0)

    o_ref[...] = h.astype(o_ref.dtype)


# ----------------------------------------------------------------------------
# One-time weight preparation (hoisted out of the per-call hot path).
# Weights are stored pre-transposed to [in, out] and padded to lane multiples.
# ----------------------------------------------------------------------------
def prepare_params(params, *, compute_dtype=jnp.bfloat16):
    D = params["w1"].shape[0]
    D_pad = _round_up(D, _LANE)

    def pad_w(w, rows, cols):
        w = w.astype(compute_dtype)
        return jnp.pad(w, ((0, rows - w.shape[0]), (0, cols - w.shape[1])))

    def pad_b(b, cols):
        b = b.astype(jnp.float32)
        return jnp.pad(b, ((0, 0), (0, cols - b.shape[1])))

    return dict(
        w1=pad_w(params["w1"], D_pad, HIDDEN),          # [D_pad, 128]
        b1=params["b1"].astype(jnp.float32),            # [1, 128]
        w2=params["w2"].astype(compute_dtype),          # [128, 128]
        b2=params["b2"].astype(jnp.float32),
        w3=params["w3"].astype(compute_dtype),          # [128, 128]
        b3=params["b3"].astype(jnp.float32),
        w4=pad_w(params["w4"], HIDDEN, D_pad),          # [128, D_pad]
        b4=pad_b(params["b4"], D_pad),                  # [1, D_pad]
    )


# ----------------------------------------------------------------------------
# Forward pass.  `prepared` is the output of prepare_params().
# ----------------------------------------------------------------------------
def ae_forward(features, prepared, *, out_dtype=None, tile_batch=None):
    B, D = features.shape
    D_pad = prepared["w1"].shape[0]
    compute_dtype = prepared["w1"].dtype
    if out_dtype is None:
        out_dtype = compute_dtype                # bf16 by default (halves write-back)

    in_sz = jnp.dtype(features.dtype).itemsize
    o_sz = jnp.dtype(out_dtype).itemsize
    c_sz = jnp.dtype(compute_dtype).itemsize

    # --- batch tile selection (sublane alignment is dtype-aware) ------------
    # When we genuinely tile the batch axis, the block's second-to-last dim
    # must be a multiple of the packed sublane tile of every batch-tiled array
    # (f32 -> 8 rows, bf16 -> 16 rows).  A single full-extent tile has no such
    # constraint, so small batches just round to 8.
    sub = max(max(8, 32 // in_sz), max(8, 32 // o_sz))

    if tile_batch is not None:
        TB = max(_round_up(int(tile_batch), sub), sub)      # validate user tile
    elif B >= 2 * 512:
        TB = 512                                            # amortize ~0.35us/step
    elif B > sub:
        TB = _round_up(-(-B // 2), sub)                      # >=2 steps for megacore
    else:
        TB = _round_up(B, 8)                                 # single full-extent tile

    B_pad = _round_up(B, TB)
    n_tiles = B_pad // TB

    # --- padding only when actually needed (skip the HBM round trip) --------
    need_pad = (B_pad != B) or (D_pad != D)
    x = features
    if need_pad:
        x = jnp.pad(x, ((0, B_pad - B), (0, D_pad - D)))

    # --- VMEM budget (v7x-safe: cap at 48 MiB of its 64 MiB physical) -------
    w_bytes = (2 * D_pad * HIDDEN + 2 * HIDDEN * HIDDEN) * c_sz   # resident weights
    bias_bytes = (3 * HIDDEN + D_pad) * 4
    tile_io = 2 * TB * D_pad * (in_sz + o_sz)                     # double-buffered x/out
    act_bytes = 4 * TB * max(D_pad, HIDDEN) * 4                   # f32 activations
    need = w_bytes + bias_bytes + tile_io + act_bytes
    vmem_limit = min(max(int(1.5 * need) + (4 << 20), 16 << 20), 48 << 20)

    # --- advisory cost estimate ---------------------------------------------
    flops = 2 * B_pad * (2 * D_pad * HIDDEN + 2 * HIDDEN * HIDDEN)
    bytes_accessed = B_pad * D_pad * (in_sz + o_sz) + w_bytes + bias_bytes

    resident = lambda shape: pl.BlockSpec(shape, lambda i: (0, 0))

    out = pl.pallas_call(
        ae_kernel,
        out_shape=jax.ShapeDtypeStruct((B_pad, D_pad), out_dtype),
        grid=(n_tiles,),
        in_specs=[
            pl.BlockSpec((TB, D_pad), lambda i: (i, 0)),   # x: batch-tiled, f32 in HBM
            resident((D_pad, HIDDEN)), resident((1, HIDDEN)),
            resident((HIDDEN, HIDDEN)), resident((1, HIDDEN)),
            resident((HIDDEN, HIDDEN)), resident((1, HIDDEN)),
            resident((HIDDEN, D_pad)), resident((1, D_pad)),
        ],
        out_specs=pl.BlockSpec((TB, D_pad), lambda i: (i, 0)),
        compiler_params=pltpu.CompilerParams(
            dimension_semantics=("parallel",),     # shard batch tiles across v7x TCs
            vmem_limit_bytes=vmem_limit,
        ),
        cost_estimate=pl.CostEstimate(
            flops=flops, transcendentals=0, bytes_accessed=bytes_accessed),
    )(x,
      prepared["w1"], prepared["b1"],
      prepared["w2"], prepared["b2"],
      prepared["w3"], prepared["b3"],
      prepared["w4"], prepared["b4"])

    if need_pad:
        out = out[:B, :D]
    return out


# ----------------------------------------------------------------------------
# Parameter init (PyTorch-style Linear init; weights transposed to [in, out]).
# ----------------------------------------------------------------------------
def init_params(key, input_shape):
    ks = jax.random.split(key, 8)

    def lin(kw, kb, fan_in, fan_out):
        bound = 1.0 / jnp.sqrt(fan_in)
        w = jax.random.uniform(kw, (fan_in, fan_out), jnp.float32, -bound, bound)
        b = jax.random.uniform(kb, (1, fan_out), jnp.float32, -bound, bound)
        return w, b

    w1, b1 = lin(ks[0], ks[1], input_shape, HIDDEN)
    w2, b2 = lin(ks[2], ks[3], HIDDEN, HIDDEN)
    w3, b3 = lin(ks[4], ks[5], HIDDEN, HIDDEN)
    w4, b4 = lin(ks[6], ks[7], HIDDEN, input_shape)
    return dict(w1=w1, b1=b1, w2=w2, b2=b2, w3=w3, b3=b3, w4=w4, b4=b4)


def ae_reference_f32(features, p):
    """Pure-JAX f32 reference (matches the PyTorch module exactly)."""
    h = jnp.maximum(features @ p["w1"] + p["b1"], 0.0)
    h = jnp.maximum(h @ p["w2"] + p["b2"], 0.0)
    h = jnp.maximum(h @ p["w3"] + p["b3"], 0.0)
    h = jnp.maximum(h @ p["w4"] + p["b4"], 0.0)
    return h


def ae_reference_matched(features, p, compute_dtype=jnp.bfloat16):
    """Pure-JAX reference with the same bf16 weight/activation quantization."""
    def layer(h, w, b):
        y = jnp.dot(h.astype(compute_dtype), w.astype(compute_dtype),
                    preferred_element_type=jnp.float32)
        return jnp.maximum(y + b.astype(jnp.float32), 0.0)

    h = layer(features, p["w1"], p["b1"])
    h = layer(h, p["w2"], p["b2"])
    h = layer(h, p["w3"], p["b3"])
    h = layer(h, p["w4"], p["b4"])
    return h


if __name__ == "__main__":
    key = jax.random.PRNGKey(0)
    k_x, k_p = jax.random.split(key)

    B, D = 8, 256  # small batch; D is 2x128 lanes so no padding path is exercised
    x = jax.random.normal(k_x, (B, D), jnp.float32)
    params = init_params(k_p, D)

    prepared = prepare_params(params)          # one-time weight prep (bf16, padded)
    out = ae_forward(x, prepared)              # bf16 output by default
    out = jax.block_until_ready(out)
    assert out.shape == (B, D), out.shape

    out_f32 = out.astype(jnp.float32)

    # Check against a reference using the same bf16 quantization.
    ref_bf16 = ae_reference_matched(x, params)
    assert jnp.allclose(out_f32, ref_bf16, atol=2e-2, rtol=2e-2), \
        "mismatch vs bf16-matched ref"

    # Loose check against the full-f32 PyTorch-equivalent reference.
    ref_f32 = ae_reference_f32(x, params)
    assert jnp.allclose(out_f32, ref_f32, atol=1e-1, rtol=1e-1), \
        "mismatch vs f32 ref"

    print("KERNEL_OK")
</pallas_src>

<mosaic_0001>
module attributes {stable_mosaic.version = 11 : i64} {
  func.func @ae_kernel(%arg0: i32, %arg1: memref<8x256xf32, #tpu.memory_space<vmem>>, %arg2: memref<256x128xbf16, #tpu.memory_space<vmem>>, %arg3: memref<1x128xf32, #tpu.memory_space<vmem>>, %arg4: memref<128x128xbf16, #tpu.memory_space<vmem>>, %arg5: memref<1x128xf32, #tpu.memory_space<vmem>>, %arg6: memref<128x128xbf16, #tpu.memory_space<vmem>>, %arg7: memref<1x128xf32, #tpu.memory_space<vmem>>, %arg8: memref<128x256xbf16, #tpu.memory_space<vmem>>, %arg9: memref<1x256xf32, #tpu.memory_space<vmem>>, %arg10: memref<8x256xbf16, #tpu.memory_space<vmem>>) attributes {dimension_semantics = [#tpu.dimension_semantics<parallel>], iteration_bounds = array<i64: 1>, scalar_prefetch = 0 : i64, scratch_operands = 0 : i64, tpu.core_type = #tpu.core_type<tc>, window_params = [{transform_indices = @transform_0, window_bounds = array<i64: 8, 256>}, {pipeline_mode = #tpu.pipeline_mode<synchronous>, transform_indices = @transform_1, window_bounds = array<i64: 256, 128>}, {pipeline_mode = #tpu.pipeline_mode<synchronous>, transform_indices = @transform_2, window_bounds = array<i64: 1, 128>}, {pipeline_mode = #tpu.pipeline_mode<synchronous>, transform_indices = @transform_3, window_bounds = array<i64: 128, 128>}, {pipeline_mode = #tpu.pipeline_mode<synchronous>, transform_indices = @transform_4, window_bounds = array<i64: 1, 128>}, {pipeline_mode = #tpu.pipeline_mode<synchronous>, transform_indices = @transform_5, window_bounds = array<i64: 128, 128>}, {pipeline_mode = #tpu.pipeline_mode<synchronous>, transform_indices = @transform_6, window_bounds = array<i64: 1, 128>}, {pipeline_mode = #tpu.pipeline_mode<synchronous>, transform_indices = @transform_7, window_bounds = array<i64: 128, 256>}, {pipeline_mode = #tpu.pipeline_mode<synchronous>, transform_indices = @transform_8, window_bounds = array<i64: 1, 256>}, {transform_indices = @transform_9, window_bounds = array<i64: 8, 256>}]} {
    %c0 = arith.constant 0 : index
    %c0_0 = arith.constant 0 : index
    %0 = vector.load %arg1[%c0, %c0_0] : memref<8x256xf32, #tpu.memory_space<vmem>>, vector<8x256xf32>
    %1 = arith.truncf %0 : vector<8x256xf32> to vector<8x256xbf16>
    %c0_1 = arith.constant 0 : index
    %c0_2 = arith.constant 0 : index
    %2 = vector.load %arg2[%c0_1, %c0_2] : memref<256x128xbf16, #tpu.memory_space<vmem>>, vector<256x128xbf16>
    %cst = arith.constant dense<0.000000e+00> : vector<8x128xf32>
    %3 = tpu.matmul %1, %2, %cst {dimension_numbers = #tpu.dot_dimension_numbers<[1], [0], [0], [1], [0, 0, 1, 1], [], []>} : vector<8x256xbf16>, vector<256x128xbf16>, vector<8x128xf32> -> vector<8x128xf32>
    %c0_3 = arith.constant 0 : index
    %c0_4 = arith.constant 0 : index
    %4 = vector.load %arg3[%c0_3, %c0_4] : memref<1x128xf32, #tpu.memory_space<vmem>>, vector<1x128xf32>
    %5 = vector.broadcast %4 : vector<1x128xf32> to vector<8x128xf32>
    %6 = arith.addf %3, %5 : vector<8x128xf32>
    %cst_5 = arith.constant 0.000000e+00 : f32
    %7 = vector.broadcast %cst_5 : f32 to vector<8x128xf32>
    %8 = arith.maximumf %6, %7 : vector<8x128xf32>
    %9 = arith.truncf %8 : vector<8x128xf32> to vector<8x128xbf16>
    %c0_6 = arith.constant 0 : index
    %c0_7 = arith.constant 0 : index
    %10 = vector.load %arg4[%c0_6, %c0_7] : memref<128x128xbf16, #tpu.memory_space<vmem>>, vector<128x128xbf16>
    %cst_8 = arith.constant dense<0.000000e+00> : vector<8x128xf32>
    %11 = tpu.matmul %9, %10, %cst_8 {dimension_numbers = #tpu.dot_dimension_numbers<[1], [0], [0], [1], [0, 0, 1, 1], [], []>} : vector<8x128xbf16>, vector<128x128xbf16>, vector<8x128xf32> -> vector<8x128xf32>
    %c0_9 = arith.constant 0 : index
    %c0_10 = arith.constant 0 : index
    %12 = vector.load %arg5[%c0_9, %c0_10] : memref<1x128xf32, #tpu.memory_space<vmem>>, vector<1x128xf32>
    %13 = vector.broadcast %12 : vector<1x128xf32> to vector<8x128xf32>
    %14 = arith.addf %11, %13 : vector<8x128xf32>
    %cst_11 = arith.constant 0.000000e+00 : f32
    %15 = vector.broadcast %cst_11 : f32 to vector<8x128xf32>
    %16 = arith.maximumf %14, %15 : vector<8x128xf32>
    %17 = arith.truncf %16 : vector<8x128xf32> to vector<8x128xbf16>
    %c0_12 = arith.constant 0 : index
    %c0_13 = arith.constant 0 : index
    %18 = vector.load %arg6[%c0_12, %c0_13] : memref<128x128xbf16, #tpu.memory_space<vmem>>, vector<128x128xbf16>
    %cst_14 = arith.constant dense<0.000000e+00> : vector<8x128xf32>
    %19 = tpu.matmul %17, %18, %cst_14 {dimension_numbers = #tpu.dot_dimension_numbers<[1], [0], [0], [1], [0, 0, 1, 1], [], []>} : vector<8x128xbf16>, vector<128x128xbf16>, vector<8x128xf32> -> vector<8x128xf32>
    %c0_15 = arith.constant 0 : index
    %c0_16 = arith.constant 0 : index
    %20 = vector.load %arg7[%c0_15, %c0_16] : memref<1x128xf32, #tpu.memory_space<vmem>>, vector<1x128xf32>
    %21 = vector.broadcast %20 : vector<1x128xf32> to vector<8x128xf32>
    %22 = arith.addf %19, %21 : vector<8x128xf32>
    %cst_17 = arith.constant 0.000000e+00 : f32
    %23 = vector.broadcast %cst_17 : f32 to vector<8x128xf32>
    %24 = arith.maximumf %22, %23 : vector<8x128xf32>
    %25 = arith.truncf %24 : vector<8x128xf32> to vector<8x128xbf16>
    %c0_18 = arith.constant 0 : index
    %c0_19 = arith.constant 0 : index
    %26 = vector.load %arg8[%c0_18, %c0_19] : memref<128x256xbf16, #tpu.memory_space<vmem>>, vector<128x256xbf16>
    %cst_20 = arith.constant dense<0.000000e+00> : vector<8x256xf32>
    %27 = tpu.matmul %25, %26, %cst_20 {dimension_numbers = #tpu.dot_dimension_numbers<[1], [0], [0], [1], [0, 0, 1, 1], [], []>} : vector<8x128xbf16>, vector<128x256xbf16>, vector<8x256xf32> -> vector<8x256xf32>
    %c0_21 = arith.constant 0 : index
    %c0_22 = arith.constant 0 : index
    %28 = vector.load %arg9[%c0_21, %c0_22] : memref<1x256xf32, #tpu.memory_space<vmem>>, vector<1x256xf32>
    %29 = vector.broadcast %28 : vector<1x256xf32> to vector<8x256xf32>
    %30 = arith.addf %27, %29 : vector<8x256xf32>
    %cst_23 = arith.constant 0.000000e+00 : f32
    %31 = vector.broadcast %cst_23 : f32 to vector<8x256xf32>
    %32 = arith.maximumf %30, %31 : vector<8x256xf32>
    %33 = arith.truncf %32 : vector<8x256xf32> to vector<8x256xbf16>
    %c0_24 = arith.constant 0 : index
    %c0_25 = arith.constant 0 : index
    %34 = vector.load %arg10[%c0_24, %c0_25] : memref<8x256xbf16, #tpu.memory_space<vmem>>, vector<8x256xbf16>
    tpu.vector_store %arg10[%c0_24, %c0_25], %33 {strides = array<i32>} : memref<8x256xbf16, #tpu.memory_space<vmem>>, vector<8x256xbf16>,
    return
  }
  func.func @transform_0(%arg0: i32) -> (i32, i32) {
    %c0_i32 = arith.constant 0 : i32
    %c0_i32_0 = arith.constant 0 : i32
    return %arg0, %c0_i32 : i32, i32
  }
  func.func @transform_1(%arg0: i32) -> (i32, i32) {
    %c0_i32 = arith.constant 0 : i32
    %c0_i32_0 = arith.constant 0 : i32
    %c0_i32_1 = arith.constant 0 : i32
    return %c0_i32, %c0_i32_0 : i32, i32
  }
  func.func @transform_2(%arg0: i32) -> (i32, i32) {
    %c0_i32 = arith.constant 0 : i32
    %c0_i32_0 = arith.constant 0 : i32
    %c0_i32_1 = arith.constant 0 : i32
    return %c0_i32, %c0_i32_0 : i32, i32
  }
  func.func @transform_3(%arg0: i32) -> (i32, i32) {
    %c0_i32 = arith.constant 0 : i32
    %c0_i32_0 = arith.constant 0 : i32
    %c0_i32_1 = arith.constant 0 : i32
    return %c0_i32, %c0_i32_0 : i32, i32
  }
  func.func @transform_4(%arg0: i32) -> (i32, i32) {
    %c0_i32 = arith.constant 0 : i32
    %c0_i32_0 = arith.constant 0 : i32
    %c0_i32_1 = arith.constant 0 : i32
    return %c0_i32, %c0_i32_0 : i32, i32
  }
  func.func @transform_5(%arg0: i32) -> (i32, i32) {
    %c0_i32 = arith.constant 0 : i32
    %c0_i32_0 = arith.constant 0 : i32
    %c0_i32_1 = arith.constant 0 : i32
    return %c0_i32, %c0_i32_0 : i32, i32
  }
  func.func @transform_6(%arg0: i32) -> (i32, i32) {
    %c0_i32 = arith.constant 0 : i32
    %c0_i32_0 = arith.constant 0 : i32
    %c0_i32_1 = arith.constant 0 : i32
    return %c0_i32, %c0_i32_0 : i32, i32
  }
  func.func @transform_7(%arg0: i32) -> (i32, i32) {
    %c0_i32 = arith.constant 0 : i32
    %c0_i32_0 = arith.constant 0 : i32
    %c0_i32_1 = arith.constant 0 : i32
    return %c0_i32, %c0_i32_0 : i32, i32
  }
  func.func @transform_8(%arg0: i32) -> (i32, i32) {
    %c0_i32 = arith.constant 0 : i32
    %c0_i32_0 = arith.constant 0 : i32
    %c0_i32_1 = arith.constant 0 : i32
    return %c0_i32, %c0_i32_0 : i32, i32
  }
  func.func @transform_9(%arg0: i32) -> (i32, i32) {
    %c0_i32 = arith.constant 0 : i32
    %c0_i32_0 = arith.constant 0 : i32
    return %arg0, %c0_i32 : i32, i32
  }
}

</mosaic_0001>

<bundles_post_ra>
// kernel: tpu_custom_call.1
= control target key start
LH: loop header
LB: loop body
LE: loop exit
PB: predicated region body
PF: predicated region fallthrough
CT: control target
= control target key end

     0   :  { %14 = vsyncpa [#allocation3], 0  ;;  %s1137_s0 = inlined_call_operand.hbm [shape: f32[8,256], index: 0, kind: input, shape index: {}]   ;;  %s1138_s1 = inlined_call_operand.hbm [shape: bf16[256,128], index: 1, kind: input, shape index: {}]   ;;  %s1139_s2 = inlined_call_operand.vmem [shape: f32[1,128], index: 2, kind: input, shape index: {}]   ;;  %s1140_s3 = inlined_call_operand.hbm [shape: bf16[128,128], index: 3, kind: input, shape index: {}]   ;;  %s1141_s4 = inlined_call_operand.hbm [shape: f32[1,128], index: 4, kind: input, shape index: {}]   ;;  %s1142_s5 = inlined_call_operand.hbm [shape: bf16[128,128], index: 5, kind: input, shape index: {}]   ;;  %s1143_s6 = inlined_call_operand.vmem [shape: f32[1,128], index: 6, kind: input, shape index: {}]   ;;  %s1144_s7 = inlined_call_operand.hbm [shape: bf16[128,256], index: 7, kind: input, shape index: {}]   ;;  %s1145_s8 = inlined_call_operand.vmem [shape: f32[1,256], index: 8, kind: input, shape index: {}]   ;;  %s1146_s9 = inlined_call_operand.hbm [shape: bf16[8,256], index: 9, kind: output, shape index: {}]  }
   0x1   :  { %15 = vsyncpa [#allocation6], 0 }
   0x2   :  { %16 = vsyncpa [#allocation9], 0 }
   0x3   :  { %17 = vsyncpa [#allocation12], 0  ;;  %s34_s11 = sshll.u32 %s1138_s1, 4  ;;  %s35_s11 = int_to_ptr.hbm [resolvable:$true] %s34_s11 }
   0x4   :  { %18 = vsyncpa [#allocation4], 0  ;;  %s1037_s12 = smov [#allocation5]   ;;  %s63_s16 = sshll.u32 %s1141_s4, 4  ;;  %s64_s16 = int_to_ptr.hbm [resolvable:$true] %s63_s16 }
   0x5   :  { %s36_s13 = sshll.u32 %s1037_s12, 4  ;;  %s1038_s17 = smov 64   ;;  %s37_s13 = int_to_ptr.vmem [resolvable:$true] %s36_s13 }
   0x6   :  { %s1039_s18 = smov 4   ;;  %s1040_s19 = smov [#allocation8]  }
   0x7   :  { %42 = dma.hbm_to_vmem [thread:$0]  %s35_s11, 2048, %s37_s13, [#allocation6], %s1038_s17, %s1038_s17, %s1039_s18  }
   0x8   :  { %s65_s20 = sshll.u32 %s1040_s19, 4  ;;  %s24_s22 = sshll.u32 %s1137_s0, 4  ;;  %s66_s20 = int_to_ptr.vmem [resolvable:$true] %s65_s20  ;;  %s25_s22 = int_to_ptr.hbm [resolvable:$true] %s24_s22 }
   0x9   :  { %68 = dma.hbm_to_vmem [thread:$0]  %s64_s16, 16, %s66_s20, [#allocation9]  }
   0xa   :  { %s49_s4 = sshll.u32 %s1140_s3, 4  ;;  %s1041_s25 = smov [#allocation2]   ;;  %s50_s4 = int_to_ptr.hbm [resolvable:$true] %s49_s4 }
   0xb   :  { %s26_s26 = sshll.u32 %s1041_s25, 4  ;;  %s1042_s27 = smov [#allocation7]   ;;  %s27_s26 = int_to_ptr.vmem [resolvable:$true] %s26_s26 }
   0xc   :  { %29 = dma.hbm_to_vmem [thread:$0]  %s25_s22, 256, %s27_s26, [#allocation3]  }
   0xd   :  { %s51_s28 = sshll.u32 %s1042_s27, 4  ;;  %s73_s10 = sshll.u32 %s1142_s5, 4  ;;  %s52_s28 = int_to_ptr.vmem [resolvable:$true] %s51_s28  ;;  %s74_s10 = int_to_ptr.hbm [resolvable:$true] %s73_s10 }
   0xe   :  { %57 = dma.hbm_to_vmem [thread:$0]  %s50_s4, 1024, %s52_s28, [#allocation6], %s1038_s17, %s1038_s17, %s1039_s18  }
   0xf   :  { %s88_s3 = sshll.u32 %s1144_s7, 4  ;;  %s1043_s12 = smov [#allocation10]   ;;  %s89_s3 = int_to_ptr.hbm [resolvable:$true] %s88_s3 }
  0x10   :  { %s75_s13 = sshll.u32 %s1043_s12, 4  ;;  %s1044_s14 = smov [#allocation11]   ;;  %s76_s13 = int_to_ptr.vmem [resolvable:$true] %s75_s13 }
  0x11   :  { %81 = dma.hbm_to_vmem [thread:$0]  %s74_s10, 1024, %s76_s13, [#allocation9], %s1038_s17, %s1038_s17, %s1039_s18  }
  0x12   :  { %s90_s5 = sshll.u32 %s1044_s14, 4  ;;  %s1045_s15 = smov 128   ;;  %s91_s5 = int_to_ptr.vmem [resolvable:$true] %s90_s5 }
  0x13   :  { %s1046_s16 = smov 8  }
  0x14   :  { %96 = dma.hbm_to_vmem [thread:$0]  %s89_s3, 2048, %s91_s5, [#allocation12], %s1045_s15, %s1045_s15, %s1046_s16  }
  0x15   :  { %1027 = dma.done.wait [#allocation3], 256  }
  0x16   :  { %1028 = vsyncadd [#allocation3], 4294967040 }
  0x17   :  { %1029 = dma.done.wait [#allocation6], 3072  }
  0x18   :  { %1030 = vsyncadd [#allocation6], 4294964224 }
  0x19   :  { %1031 = dma.done.wait [#allocation9], 1040  }
  0x1a   :  { %1032 = vsyncadd [#allocation9], 4294966256 }
  0x1b   :  { %1033 = dma.done.wait [#allocation12], 2048  }
  0x1c   :  { %1034 = vsyncadd [#allocation12], 4294965248  ;;  %v804_v0 = vld [vmem:[#allocation5 + $0x38] sm:$0xff]  ;;  %v803_v2 = vld [vmem:[#allocation5 + $0x30] sm:$0xff]  ;;  %s1047_s21 = smov [#allocation13]   ;;  %s592_s23 = sshll.u32 %s1146_s9, 4  ;;  %s593_s23 = int_to_ptr.hbm [resolvable:$true] %s592_s23 }
  0x1d   :  { %v812_v1 = vld [vmem:[#allocation5 + $0x78] sm:$0xff]  ;;  %259 = vmatpush.bf16.msra.mxu0 %v804_v0  ;;  %v811_v3 = vld [vmem:[#allocation5 + $0x70] sm:$0xff]  ;;  %v802_v4 = vld [vmem:[#allocation5 + $0x28] sm:$0xff]  ;;  %s590_s1 = sshll.u32 %s1047_s21, 4  ;;  %s591_s1 = int_to_ptr.vmem [resolvable:$true] %s590_s1 }
  0x1e   :  { %272 = vmatpush.bf16.msra.mxu1 %v812_v1  ;;  %v810_v5 = vld [vmem:[#allocation5 + $0x68] sm:$0xff]  ;;  %v820_v6 = vld [vmem:[#allocation7 + $0x38] sm:$0xff]  ;;  %v819_v7 = vld [vmem:[#allocation7 + $0x30] sm:$0xff] }
  0x1f   :  { %355 = vmatpush.bf16.msra.mxu2 %v820_v6  ;;  %v801_v8 = vld [vmem:[#allocation5 + $0x20] sm:$0xff]  ;;  %v818_v10 = vld [vmem:[#allocation7 + $0x28] sm:$0xff]  ;;  %v800_v11 = vld [vmem:[#allocation5 + $0x18] sm:$0xff] }
  0x20   :  { %v809_v9 = vld [vmem:[#allocation5 + $0x60] sm:$0xff]  ;;  %v808_v12 = vld [vmem:[#allocation5 + $0x58] sm:$0xff]  ;;  %v799_v14 = vld [vmem:[#allocation5 + $0x10] sm:$0xff] }
  0x21   :  { %260 = vmatpush.bf16.msra.mxu0 %v803_v2  ;;  %v817_v13 = vld [vmem:[#allocation7 + $0x20] sm:$0xff]  ;;  %v807_v15 = vld [vmem:[#allocation5 + $0x50] sm:$0xff]  ;;  %v816_v16 = vld [vmem:[#allocation7 + $0x18] sm:$0xff] }
  0x22   :  { %273 = vmatpush.bf16.msra.mxu1 %v811_v3  ;;  %v798_v17 = vld [vmem:[#allocation5 + $0x8] sm:$0xff]  ;;  %v815_v19 = vld [vmem:[#allocation7 + $0x10] sm:$0xff]  ;;  %v797_v20 = vld [vmem:[#allocation5] sm:$0xff] }
  0x23   :  { %356 = vmatpush.bf16.msra.mxu2 %v819_v7  ;;  %v806_v18 = vld [vmem:[#allocation5 + $0x48] sm:$0xff]  ;;  %v805_v21 = vld [vmem:[#allocation5 + $0x40] sm:$0xff]  ;;  %v123_v22 = vld [vmem:[#allocation2] sm:$0xff] }
  0x24   :  { %v124_v23 = vld [vmem:[#allocation2 + $0x8] sm:$0xff]  ;;  %v125_v24 = vpack.c.bf16 %v123_v22, %v123_v22  ;;  %v814_v26 = vld [vmem:[#allocation7 + $0x8] sm:$0xff]  ;;  %v813_v27 = vld [vmem:[#allocation7] sm:$0xff] }
  0x25   :  { %261 = vmatpush.bf16.msra.mxu0 %v802_v4  ;;  %v126_v25 = vpack.c.bf16 %v124_v23, %v124_v23  ;;  %v828_v28 = vld [vmem:[#allocation10 + $0x38] sm:$0xff]  ;;  %v827_v29 = vld [vmem:[#allocation10 + $0x30] sm:$0xff]  ;;  %v826_v30 = vld [vmem:[#allocation10 + $0x28] sm:$0xff] }
  0x26   :  { %274 = vmatpush.bf16.msra.mxu1 %v810_v5  ;;  %438 = vmatpush.bf16.msra.mxu3 %v828_v28  ;;  %v825_v31 = vld [vmem:[#allocation10 + $0x20] sm:$0xff]  ;;  %v824_v32 = vld [vmem:[#allocation10 + $0x18] sm:$0xff]  ;;  %v823_v33 = vld [vmem:[#allocation10 + $0x10] sm:$0xff] }
  0x27   :  { %357 = vmatpush.bf16.msra.mxu2 %v818_v10  ;;  %v856_v34 = vld [vmem:[%s1139_s2] ss:$0 sm:$0xff]  ;;  %v821_v44 = vld [vmem:[#allocation10] sm:$0xff]  ;;  %v791_v45 = vld [vmem:[#allocation11 + $0x70] sm:$0xf] }
  0x28   :  { %v822_v43 = vld [vmem:[#allocation10 + $0x8] sm:$0xff]  ;;  %v844_v46 = vld [vmem:[#allocation11 + $0x74] sm:$0xf0]  ;;  %v843_v47 = vld [vmem:[#allocation11 + $0x74] sm:$0xf] }
  0x29   :  { %262 = vmatpush.bf16.msra.mxu0 %v801_v8  ;;  %v792_v48 = vor.u32 %v844_v46, %v791_v45  ;;  %v793_v49 = vld [vmem:[#allocation11 + $0x78] sm:$0xf0]  ;;  %v783_v50 = vld [vmem:[#allocation11 + $0x60] sm:$0xf]  ;;  %v842_v51 = vld [vmem:[#allocation11 + $0x64] sm:$0xf0] }
  0x2a   :  { %275 = vmatpush.bf16.msra.mxu1 %v809_v9  ;;  %439 = vmatpush.bf16.msra.mxu3 %v827_v29  ;;  %v796_v52 = vor.u32 %v843_v47, %v793_v49  ;;  %v841_v53 = vld [vmem:[#allocation11 + $0x64] sm:$0xf]  ;;  %v785_v54 = vld [vmem:[#allocation11 + $0x68] sm:$0xf0]  ;;  %v784_v55 = vor.u32 %v842_v51, %v783_v50  ;;  %v775_v57 = vld [vmem:[#allocation11 + $0x50] sm:$0xf] }
  0x2b   :  { %358 = vmatpush.bf16.msra.mxu2 %v817_v13  ;;  %v788_v56 = vor.u32 %v841_v53, %v785_v54  ;;  %v840_v58 = vld [vmem:[#allocation11 + $0x54] sm:$0xf0]  ;;  %v839_v59 = vld [vmem:[#allocation11 + $0x54] sm:$0xf]  ;;  %v777_v60 = vld [vmem:[#allocation11 + $0x58] sm:$0xf0] }
  0x2c   :  { %v776_v61 = vor.u32 %v840_v58, %v775_v57  ;;  %v780_v62 = vor.u32 %v839_v59, %v777_v60  ;;  %v767_v63 = vld [vmem:[#allocation11 + $0x40] sm:$0xf]  ;;  %v838_v0 = vld [vmem:[#allocation11 + $0x44] sm:$0xf0]  ;;  %v837_v1 = vld [vmem:[#allocation11 + $0x44] sm:$0xf] }
  0x2d   :  { %263 = vmatpush.bf16.msra.mxu0 %v800_v11  ;;  %v769_v2 = vld [vmem:[#allocation11 + $0x48] sm:$0xf0]  ;;  %v768_v3 = vor.u32 %v838_v0, %v767_v63  ;;  %v759_v5 = vld [vmem:[#allocation11 + $0x30] sm:$0xf]  ;;  %v836_v6 = vld [vmem:[#allocation11 + $0x34] sm:$0xf0] }
  0x2e   :  { %276 = vmatpush.bf16.msra.mxu1 %v808_v12  ;;  %440 = vmatpush.bf16.msra.mxu3 %v826_v30  ;;  %v772_v4 = vor.u32 %v837_v1, %v769_v2  ;;  %v835_v7 = vld [vmem:[#allocation11 + $0x34] sm:$0xf]  ;;  %v761_v8 = vld [vmem:[#allocation11 + $0x38] sm:$0xf0]  ;;  %v760_v9 = vor.u32 %v836_v6, %v759_v5  ;;  %v751_v11 = vld [vmem:[#allocation11 + $0x20] sm:$0xf] }
  0x2f   :  { %359 = vmatpush.bf16.msra.mxu2 %v816_v16  ;;  %v764_v10 = vor.u32 %v835_v7, %v761_v8  ;;  %v834_v12 = vld [vmem:[#allocation11 + $0x24] sm:$0xf0]  ;;  %v833_v13 = vld [vmem:[#allocation11 + $0x24] sm:$0xf]  ;;  %v743_v23 = vld [vmem:[#allocation11 + $0x10] sm:$0xf] }
  0x30   :  { %v735_v29 = vld [vmem:[#allocation11] sm:$0xf]  ;;  %v830_v30 = vld [vmem:[#allocation11 + $0x4] sm:$0xf0] }
  0x31   :  { %264 = vmatpush.bf16.msra.mxu0 %v799_v14  ;;  %v753_v14 = vld [vmem:[#allocation11 + $0x28] sm:$0xf0] }
  0x32   :  { %277 = vmatpush.bf16.msra.mxu1 %v807_v15  ;;  %441 = vmatpush.bf16.msra.mxu3 %v825_v31  ;;  %v752_v15 = vor.u32 %v834_v12, %v751_v11  ;;  %v756_v16 = vor.u32 %v833_v13, %v753_v14  ;;  %v829_v31 = vld [vmem:[#allocation11 + $0x4] sm:$0xf] }
  0x33   :  { %360 = vmatpush.bf16.msra.mxu2 %v815_v19 }
  0x35   :  { %265 = vmatpush.bf16.msra.mxu0 %v798_v17  ;;  %v857_v17 = vld [vmem:[#allocation8] ss:$0 sm:$0xff] }
  0x36   :  { %278 = vmatpush.bf16.msra.mxu1 %v806_v18  ;;  %442 = vmatpush.bf16.msra.mxu3 %v824_v32  ;;  %v736_v32 = vor.u32 %v830_v30, %v735_v29 }
  0x37   :  { %361 = vmatpush.bf16.msra.mxu2 %v814_v26 }
  0x39   :  { %266 = vmatpush.bf16.msra.mxu0 %v797_v20 }
  0x3a   :  { %279 = vmatpush.bf16.msra.mxu1 %v805_v21  ;;  %443 = vmatpush.bf16.msra.mxu3 %v823_v33  ;;  %v737_v33 = vld [vmem:[#allocation11 + $0x8] sm:$0xf0] }
  0x3b   :  { %362 = vmatpush.bf16.msra.mxu2 %v813_v27  ;;  %v745_v27 = vld [vmem:[#allocation11 + $0x18] sm:$0xf0] }
  0x3c   :  { %267 = vmatmul.bf16.vlgmr.msra.gmra.mxu0 %v125_v24  ;;  %v832_v24 = vld [vmem:[#allocation11 + $0x14] sm:$0xf0] }
  0x3d   :  { %280 = vmatmul.bf16.vlgmr.msra.gmra.mxu1 %v126_v25  ;;  %555 = vmatpush.bf16.msrb.mxu0 %v792_v48  ;;  %v831_v25 = vld [vmem:[#allocation11 + $0x14] sm:$0xf]  ;;  %v744_v26 = vor.u32 %v832_v24, %v743_v23 }
  0x3e   :  { %444 = vmatpush.bf16.msra.mxu3 %v822_v43  ;;  %568 = vmatpush.bf16.msrb.mxu1 %v796_v52  ;;  %v748_v28 = vor.u32 %v831_v25, %v745_v27 }
  0x41   :  { %556 = vmatpush.bf16.msrb.mxu0 %v784_v55 }
  0x42   :  { %445 = vmatpush.bf16.msra.mxu3 %v821_v44  ;;  %569 = vmatpush.bf16.msrb.mxu1 %v788_v56 }
  0x45   :  { %557 = vmatpush.bf16.msrb.mxu0 %v776_v61 }
  0x46   :  { %570 = vmatpush.bf16.msrb.mxu1 %v780_v62 }
  0x49   :  { %558 = vmatpush.bf16.msrb.mxu0 %v768_v3 }
  0x4a   :  { %571 = vmatpush.bf16.msrb.mxu1 %v772_v4 }
  0x4d   :  { %559 = vmatpush.bf16.msrb.mxu0 %v760_v9 }
  0x4e   :  { %572 = vmatpush.bf16.msrb.mxu1 %v764_v10 }
  0x51   :  { %560 = vmatpush.bf16.msrb.mxu0 %v752_v15 }
  0x52   :  { %573 = vmatpush.bf16.msrb.mxu1 %v756_v16 }
  0x55   :  { %561 = vmatpush.bf16.msrb.mxu0 %v744_v26 }
  0x56   :  { %574 = vmatpush.bf16.msrb.mxu1 %v748_v28 }
  0x59   :  { %562 = vmatpush.bf16.msrb.mxu0 %v736_v32 }
  0xb9   :  { %v268_v35 = vpop.f32.mrf.mxu0 }
  0xba   :  { %v281_v36 = vpop.f32.mrf.mxu1  ;;  %v269_v37 = vadd.f32 %v856_v34, %v268_v35  ;;  %v740_v34 = vor.u32 %v829_v31, %v737_v33  ;;  %v858_v35 = vld [vmem:[%s1143_s6] ss:$0 sm:$0xff] }
  0xbc   :  { %v282_v38 = vadd.f32 %v281_v36, %v269_v37  ;;  %575 = vmatpush.bf16.msrb.mxu1 %v740_v34 }
  0xbe   :  { %v285_v39 = vmax.f32 %v282_v38, 0.0 }
  0xc0   :  { %v286_v40 = vpack.c.bf16 %v285_v39, %v285_v39 }
  0xc1   :  { %v270_v41 = vpop.f32.mrf.mxu0 }
  0xc2   :  { %v283_v42 = vpop.f32.mrf.mxu1  ;;  %363 = vmatmul.bf16.vlgmr.msra.gmra.mxu2 %v286_v40  ;;  %v469_v41 = vld [vmem:[%s1145_s8] sm:$0x3] }
  0xc3   :  { %v471_v42 = vperm.slane %v469_v41, 0  ;;  %v472_v43 = vperm.slane %v469_v41, 1 }
 0x145   :  { %v364_v18 = vpop.f32.mrf.mxu2 }
 0x146   :  { %v365_v19 = vadd.f32 %v857_v17, %v364_v18 }
 0x148   :  { %v368_v20 = vmax.f32 %v365_v19, 0.0 }
 0x14a   :  { %v369_v21 = vpack.c.bf16 %v368_v20, %v368_v20 }
 0x14c   :  { %446 = vmatmul.bf16.vlgmr.msra.gmra.mxu3 %v369_v21 }
 0x14d   :  { %v366_v22 = vpop.f32.mrf.mxu2 }
 0x1cf   :  { %v447_v36 = vpop.f32.mrf.mxu3 }
 0x1d0   :  { %v448_v37 = vadd.f32 %v858_v35, %v447_v36 }
 0x1d2   :  { %v451_v38 = vmax.f32 %v448_v37, 0.0 }
 0x1d4   :  { %v452_v39 = vpack.c.bf16 %v451_v38, %v451_v38 }
 0x1d6   :  { %563 = vmatmul.bf16.vlgmr.msrb.gmra.mxu0 %v452_v39  ;;  %576 = vmatmul.bf16.vlgmr.msrb.gmra.mxu1 %v452_v39 }
 0x1d7   :  { %v449_v40 = vpop.f32.mrf.mxu3 }
 0x253   :  { %v564_v44 = vpop.f32.mrf.mxu0  ;;  %v577_v45 = vpop.f32.mrf.mxu1 }
 0x254   :  { %v565_v46 = vadd.f32 %v564_v44, %v471_v42  ;;  %v578_v47 = vadd.f32 %v577_v45, %v472_v43 }
 0x256   :  { %v581_v48 = vmax.f32 %v565_v46, 0.0  ;;  %v582_v49 = vmax.f32 %v578_v47, 0.0 }
 0x258   :  { %v583_v50 = vpack.c.bf16 %v582_v49, %v581_v48 }
 0x25a   :  { %584 = vst [vmem:[#allocation13] sm:$0xff] %v583_v50 }
 0x25b   :  { %v566_v51 = vpop.f32.mrf.mxu0  ;;  %v579_v52 = vpop.f32.mrf.mxu1  ;;  %595 = dma.vmem_to_hbm [thread:$0]  %s591_s1, 128, %s593_s23, [#allocation4]  }
 0x25c   :  { %1035 = dma.done.wait [#allocation4], 128  }
 0x25d   :  { %1036 = vsyncadd [#allocation4], 4294967168 }
 0x25e   :  { %600 = vsyncpa [#allocation3], 1 }
 0x25f   :  { %601 = vsyncpa [#allocation6], 1 }
 0x260   :  { %602 = vsyncpa [#allocation9], 1 }
 0x261   :  { %603 = vsyncpa [#allocation12], 1 }
 0x262   :  { %604 = vsyncpa [#allocation4], 1 }

</bundles_post_ra>
